<compile_context>
chip_gen: v6e
topology: v6e:2x2x1
jax: 0.10.0
libtpu: 0.0.40
codegen_flags: <defaults>
</compile_context>

<pallas_src>
import jax
import jax.numpy as jnp
from jax.experimental import pallas as pl
from jax.experimental.pallas import tpu as pltpu


def ffnn_kernel(x_ref,
                w1_ref, b1_ref,
                w2_ref, b2_ref,
                w3_ref, b3_ref,
                w4_ref, b4_ref,
                o_ref):
    """Fused 4-layer MLP: sigmoid(relu(relu(relu(x@W1+b1)@W2+b2)@W3+b3)@W4+b4)."""
    bf16 = jnp.bfloat16

    # Hoist bias loads (f32) once per invocation.
    b1 = b1_ref[...]
    b2 = b2_ref[...]
    b3 = b3_ref[...]
    b4 = b4_ref[...]

    x = x_ref[...]  # (tile_b, in_p) f32

    # bf16 MXU operands, f32 accumulation, f32 epilogue (dropout = identity in eval).
    h = jnp.dot(x.astype(bf16), w1_ref[...],
                preferred_element_type=jnp.float32) + b1
    h = jnp.maximum(h, 0.0)

    h = jnp.dot(h.astype(bf16), w2_ref[...],
                preferred_element_type=jnp.float32) + b2
    h = jnp.maximum(h, 0.0)

    h = jnp.dot(h.astype(bf16), w3_ref[...],
                preferred_element_type=jnp.float32) + b3
    h = jnp.maximum(h, 0.0)

    h = jnp.dot(h.astype(bf16), w4_ref[...],
                preferred_element_type=jnp.float32) + b4
    o_ref[...] = jax.nn.sigmoid(h).astype(o_ref.dtype)


def _round_up(n, m):
    return ((n + m - 1) // m) * m


def ffnn_forward(x, params, *, batch_tile=None):
    """x: (B, input_size) f32.  params: dict of transposed bf16 weights / f32 biases."""
    B, in_size = x.shape
    hidden = params["w1"].shape[1]
    out_size = params["w4"].shape[1]

    # Lane-dense padded feature dims (multiples of 128): full-lane matmuls and
    # unmasked output stores. Zero padding is exact through the ReLU chain.
    in_p = _round_up(in_size, 128)
    hid_p = _round_up(hidden, 128)
    out_p = _round_up(out_size, 128)

    # Large batch tiles feed the MXU (128-512 rows); pad ragged batches.
    if batch_tile is None:
        batch_tile = min(512, _round_up(B, 16))
    batch_tile = max(16, _round_up(int(batch_tile), 16))
    B_p = _round_up(B, batch_tile)
    grid = (B_p // batch_tile,)

    f32 = jnp.float32
    bf16 = jnp.bfloat16

    xp = jnp.zeros((B_p, in_p), f32).at[:B, :in_size].set(x.astype(f32))

    def pad_w(w, r, c):
        return jnp.zeros((r, c), bf16).at[:w.shape[0], :w.shape[1]].set(w.astype(bf16))

    def pad_b(b, c):
        return jnp.zeros((1, c), f32).at[:, :b.shape[1]].set(b.astype(f32))

    w1 = pad_w(params["w1"], in_p, hid_p);  b1 = pad_b(params["b1"], hid_p)
    w2 = pad_w(params["w2"], hid_p, hid_p); b2 = pad_b(params["b2"], hid_p)
    w3 = pad_w(params["w3"], hid_p, hid_p); b3 = pad_b(params["b3"], hid_p)
    w4 = pad_w(params["w4"], hid_p, out_p); b4 = pad_b(params["b4"], out_p)

    # Grid-invariant full-extent blocks: weights/biases stay resident in VMEM.
    def full_spec(shape):
        return pl.BlockSpec(shape, lambda i: (0, 0))

    # VMEM budget: double-buffered x/out tiles + resident bf16 weights + slack,
    # clamped with headroom under the v7x 64 MiB per-TC budget.
    weight_bytes = 2 * (in_p * hid_p + 2 * hid_p * hid_p + hid_p * out_p)
    bias_bytes = 4 * (3 * hid_p + out_p)
    io_bytes = 4 * batch_tile * (in_p + out_p)
    need = 2 * (weight_bytes + bias_bytes + io_bytes) + 4 * batch_tile * hid_p
    vmem_limit = int(min(max(2 * need + (4 << 20), 16 << 20), 56 << 20))

    flops = 2 * B_p * (in_p * hid_p + 2 * hid_p * hid_p + hid_p * out_p)
    cost = pl.CostEstimate(
        flops=int(flops),
        transcendentals=int(B_p * out_p),
        bytes_accessed=int(B_p * in_p * 4 + weight_bytes + bias_bytes
                           + B_p * out_p * 4),
    )

    out_padded = pl.pallas_call(
        ffnn_kernel,
        out_shape=jax.ShapeDtypeStruct((B_p, out_p), f32),
        grid_spec=pltpu.PrefetchScalarGridSpec(
            num_scalar_prefetch=0,
            grid=grid,
            in_specs=[
                pl.BlockSpec((batch_tile, in_p), lambda i: (i, 0)),  # x tile
                full_spec((in_p, hid_p)),   full_spec((1, hid_p)),   # w1, b1
                full_spec((hid_p, hid_p)),  full_spec((1, hid_p)),   # w2, b2
                full_spec((hid_p, hid_p)),  full_spec((1, hid_p)),   # w3, b3
                full_spec((hid_p, out_p)),  full_spec((1, out_p)),   # w4, b4
            ],
            out_specs=pl.BlockSpec((batch_tile, out_p), lambda i: (i, 0)),
        ),
        compiler_params=pltpu.CompilerParams(
            dimension_semantics=("parallel",),
            vmem_limit_bytes=vmem_limit,
        ),
        cost_estimate=cost,
    )(xp, w1, b1, w2, b2, w3, b3, w4, b4)

    return out_padded[:B, :out_size]


def init_params(key, input_size, n_hidden_units, out_size):
    """Deterministic init mimicking nn.Linear's default uniform init.

    Weights stored already transposed to (in_features, out_features) as bf16
    (MXU operand dtype); biases kept f32 for the f32 epilogue."""
    def linear(key, fan_in, fan_out):
        kw, kb = jax.random.split(key)
        bound = 1.0 / jnp.sqrt(fan_in)
        w = jax.random.uniform(kw, (fan_in, fan_out), jnp.float32, -bound, bound)
        b = jax.random.uniform(kb, (1, fan_out), jnp.float32, -bound, bound)
        return w.astype(jnp.bfloat16), b

    k1, k2, k3, k4 = jax.random.split(key, 4)
    w1, b1 = linear(k1, input_size, n_hidden_units)
    w2, b2 = linear(k2, n_hidden_units, n_hidden_units)
    w3, b3 = linear(k3, n_hidden_units, n_hidden_units)
    w4, b4 = linear(k4, n_hidden_units, out_size)
    return dict(w1=w1, b1=b1, w2=w2, b2=b2, w3=w3, b3=b3, w4=w4, b4=b4)


def ffnn_reference(x, p):
    """Pure-JAX reference mirroring the kernel's bf16-operand / f32-accum math."""
    def layer(h, w, b):
        return jnp.dot(h.astype(jnp.bfloat16), w.astype(jnp.bfloat16),
                       preferred_element_type=jnp.float32) + b
    h = jnp.maximum(layer(x, p["w1"], p["b1"]), 0.0)
    h = jnp.maximum(layer(h, p["w2"], p["b2"]), 0.0)
    h = jnp.maximum(layer(h, p["w3"], p["b3"]), 0.0)
    return jax.nn.sigmoid(layer(h, p["w4"], p["b4"]))


if __name__ == "__main__":
    key = jax.random.PRNGKey(0)
    kx, kp = jax.random.split(key)

    batch, input_size, n_hidden_units, out_size = 16, 16, 32, 4
    x = jax.random.normal(kx, (batch, input_size), jnp.float32)
    params = init_params(kp, input_size, n_hidden_units, out_size)

    out = ffnn_forward(x, params)          # toy case: batch_tile=B, grid=(1,)
    out = jax.block_until_ready(out)

    ref = ffnn_reference(x, params)
    assert out.shape == (batch, out_size)
    assert jnp.allclose(out, ref, atol=2e-3, rtol=2e-3), "mismatch vs reference"

    print("KERNEL_OK")
</pallas_src>

<mosaic_0001>
module attributes {stable_mosaic.version = 11 : i64} {
  func.func @ffnn_kernel(%arg0: i32, %arg1: memref<16x128xf32, #tpu.memory_space<vmem>>, %arg2: memref<128x128xbf16, #tpu.memory_space<vmem>>, %arg3: memref<1x128xf32, #tpu.memory_space<vmem>>, %arg4: memref<128x128xbf16, #tpu.memory_space<vmem>>, %arg5: memref<1x128xf32, #tpu.memory_space<vmem>>, %arg6: memref<128x128xbf16, #tpu.memory_space<vmem>>, %arg7: memref<1x128xf32, #tpu.memory_space<vmem>>, %arg8: memref<128x128xbf16, #tpu.memory_space<vmem>>, %arg9: memref<1x128xf32, #tpu.memory_space<vmem>>, %arg10: memref<16x128xf32, #tpu.memory_space<vmem>>) attributes {dimension_semantics = [#tpu.dimension_semantics<parallel>], iteration_bounds = array<i64: 1>, scalar_prefetch = 0 : i64, scratch_operands = 0 : i64, tpu.core_type = #tpu.core_type<tc>, window_params = [{transform_indices = @transform_0, window_bounds = array<i64: 16, 128>}, {pipeline_mode = #tpu.pipeline_mode<synchronous>, transform_indices = @transform_1, window_bounds = array<i64: 128, 128>}, {pipeline_mode = #tpu.pipeline_mode<synchronous>, transform_indices = @transform_2, window_bounds = array<i64: 1, 128>}, {pipeline_mode = #tpu.pipeline_mode<synchronous>, transform_indices = @transform_3, window_bounds = array<i64: 128, 128>}, {pipeline_mode = #tpu.pipeline_mode<synchronous>, transform_indices = @transform_4, window_bounds = array<i64: 1, 128>}, {pipeline_mode = #tpu.pipeline_mode<synchronous>, transform_indices = @transform_5, window_bounds = array<i64: 128, 128>}, {pipeline_mode = #tpu.pipeline_mode<synchronous>, transform_indices = @transform_6, window_bounds = array<i64: 1, 128>}, {pipeline_mode = #tpu.pipeline_mode<synchronous>, transform_indices = @transform_7, window_bounds = array<i64: 128, 128>}, {pipeline_mode = #tpu.pipeline_mode<synchronous>, transform_indices = @transform_8, window_bounds = array<i64: 1, 128>}, {transform_indices = @transform_9, window_bounds = array<i64: 16, 128>}]} {
    %c0 = arith.constant 0 : index
    %c0_0 = arith.constant 0 : index
    %0 = vector.load %arg3[%c0, %c0_0] : memref<1x128xf32, #tpu.memory_space<vmem>>, vector<1x128xf32>
    %c0_1 = arith.constant 0 : index
    %c0_2 = arith.constant 0 : index
    %1 = vector.load %arg5[%c0_1, %c0_2] : memref<1x128xf32, #tpu.memory_space<vmem>>, vector<1x128xf32>
    %c0_3 = arith.constant 0 : index
    %c0_4 = arith.constant 0 : index
    %2 = vector.load %arg7[%c0_3, %c0_4] : memref<1x128xf32, #tpu.memory_space<vmem>>, vector<1x128xf32>
    %c0_5 = arith.constant 0 : index
    %c0_6 = arith.constant 0 : index
    %3 = vector.load %arg9[%c0_5, %c0_6] : memref<1x128xf32, #tpu.memory_space<vmem>>, vector<1x128xf32>
    %c0_7 = arith.constant 0 : index
    %c0_8 = arith.constant 0 : index
    %4 = vector.load %arg1[%c0_7, %c0_8] : memref<16x128xf32, #tpu.memory_space<vmem>>, vector<16x128xf32>
    %5 = arith.truncf %4 : vector<16x128xf32> to vector<16x128xbf16>
    %c0_9 = arith.constant 0 : index
    %c0_10 = arith.constant 0 : index
    %6 = vector.load %arg2[%c0_9, %c0_10] : memref<128x128xbf16, #tpu.memory_space<vmem>>, vector<128x128xbf16>
    %cst = arith.constant dense<0.000000e+00> : vector<16x128xf32>
    %7 = tpu.matmul %5, %6, %cst {dimension_numbers = #tpu.dot_dimension_numbers<[1], [0], [0], [1], [0, 0, 1, 1], [], []>} : vector<16x128xbf16>, vector<128x128xbf16>, vector<16x128xf32> -> vector<16x128xf32>
    %8 = vector.broadcast %0 : vector<1x128xf32> to vector<16x128xf32>
    %9 = arith.addf %7, %8 : vector<16x128xf32>
    %cst_11 = arith.constant 0.000000e+00 : f32
    %10 = vector.broadcast %cst_11 : f32 to vector<16x128xf32>
    %11 = arith.maximumf %9, %10 : vector<16x128xf32>
    %12 = arith.truncf %11 : vector<16x128xf32> to vector<16x128xbf16>
    %c0_12 = arith.constant 0 : index
    %c0_13 = arith.constant 0 : index
    %13 = vector.load %arg4[%c0_12, %c0_13] : memref<128x128xbf16, #tpu.memory_space<vmem>>, vector<128x128xbf16>
    %cst_14 = arith.constant dense<0.000000e+00> : vector<16x128xf32>
    %14 = tpu.matmul %12, %13, %cst_14 {dimension_numbers = #tpu.dot_dimension_numbers<[1], [0], [0], [1], [0, 0, 1, 1], [], []>} : vector<16x128xbf16>, vector<128x128xbf16>, vector<16x128xf32> -> vector<16x128xf32>
    %15 = vector.broadcast %1 : vector<1x128xf32> to vector<16x128xf32>
    %16 = arith.addf %14, %15 : vector<16x128xf32>
    %cst_15 = arith.constant 0.000000e+00 : f32
    %17 = vector.broadcast %cst_15 : f32 to vector<16x128xf32>
    %18 = arith.maximumf %16, %17 : vector<16x128xf32>
    %19 = arith.truncf %18 : vector<16x128xf32> to vector<16x128xbf16>
    %c0_16 = arith.constant 0 : index
    %c0_17 = arith.constant 0 : index
    %20 = vector.load %arg6[%c0_16, %c0_17] : memref<128x128xbf16, #tpu.memory_space<vmem>>, vector<128x128xbf16>
    %cst_18 = arith.constant dense<0.000000e+00> : vector<16x128xf32>
    %21 = tpu.matmul %19, %20, %cst_18 {dimension_numbers = #tpu.dot_dimension_numbers<[1], [0], [0], [1], [0, 0, 1, 1], [], []>} : vector<16x128xbf16>, vector<128x128xbf16>, vector<16x128xf32> -> vector<16x128xf32>
    %22 = vector.broadcast %2 : vector<1x128xf32> to vector<16x128xf32>
    %23 = arith.addf %21, %22 : vector<16x128xf32>
    %cst_19 = arith.constant 0.000000e+00 : f32
    %24 = vector.broadcast %cst_19 : f32 to vector<16x128xf32>
    %25 = arith.maximumf %23, %24 : vector<16x128xf32>
    %26 = arith.truncf %25 : vector<16x128xf32> to vector<16x128xbf16>
    %c0_20 = arith.constant 0 : index
    %c0_21 = arith.constant 0 : index
    %27 = vector.load %arg8[%c0_20, %c0_21] : memref<128x128xbf16, #tpu.memory_space<vmem>>, vector<128x128xbf16>
    %cst_22 = arith.constant dense<0.000000e+00> : vector<16x128xf32>
    %28 = tpu.matmul %26, %27, %cst_22 {dimension_numbers = #tpu.dot_dimension_numbers<[1], [0], [0], [1], [0, 0, 1, 1], [], []>} : vector<16x128xbf16>, vector<128x128xbf16>, vector<16x128xf32> -> vector<16x128xf32>
    %29 = vector.broadcast %3 : vector<1x128xf32> to vector<16x128xf32>
    %30 = arith.addf %28, %29 : vector<16x128xf32>
    %31 = arith.negf %30 : vector<16x128xf32>
    %32 = math.exp %31 : vector<16x128xf32>
    %cst_23 = arith.constant 1.000000e+00 : f32
    %33 = vector.broadcast %cst_23 : f32 to vector<16x128xf32>
    %34 = arith.addf %33, %32 : vector<16x128xf32>
    %35 = arith.divf %33, %34 : vector<16x128xf32>
    %c0_24 = arith.constant 0 : index
    %c0_25 = arith.constant 0 : index
    %36 = vector.load %arg10[%c0_24, %c0_25] : memref<16x128xf32, #tpu.memory_space<vmem>>, vector<16x128xf32>
    tpu.vector_store %arg10[%c0_24, %c0_25], %35 {strides = array<i32>} : memref<16x128xf32, #tpu.memory_space<vmem>>, vector<16x128xf32>,
    return
  }
  func.func @transform_0(%arg0: i32) -> (i32, i32) {
    %c0_i32 = arith.constant 0 : i32
    %c0_i32_0 = arith.constant 0 : i32
    return %arg0, %c0_i32 : i32, i32
  }
  func.func @transform_1(%arg0: i32) -> (i32, i32) {
    %c0_i32 = arith.constant 0 : i32
    %c0_i32_0 = arith.constant 0 : i32
    %c0_i32_1 = arith.constant 0 : i32
    return %c0_i32, %c0_i32_0 : i32, i32
  }
  func.func @transform_2(%arg0: i32) -> (i32, i32) {
    %c0_i32 = arith.constant 0 : i32
    %c0_i32_0 = arith.constant 0 : i32
    %c0_i32_1 = arith.constant 0 : i32
    return %c0_i32, %c0_i32_0 : i32, i32
  }
  func.func @transform_3(%arg0: i32) -> (i32, i32) {
    %c0_i32 = arith.constant 0 : i32
    %c0_i32_0 = arith.constant 0 : i32
    %c0_i32_1 = arith.constant 0 : i32
    return %c0_i32, %c0_i32_0 : i32, i32
  }
  func.func @transform_4(%arg0: i32) -> (i32, i32) {
    %c0_i32 = arith.constant 0 : i32
    %c0_i32_0 = arith.constant 0 : i32
    %c0_i32_1 = arith.constant 0 : i32
    return %c0_i32, %c0_i32_0 : i32, i32
  }
  func.func @transform_5(%arg0: i32) -> (i32, i32) {
    %c0_i32 = arith.constant 0 : i32
    %c0_i32_0 = arith.constant 0 : i32
    %c0_i32_1 = arith.constant 0 : i32
    return %c0_i32, %c0_i32_0 : i32, i32
  }
  func.func @transform_6(%arg0: i32) -> (i32, i32) {
    %c0_i32 = arith.constant 0 : i32
    %c0_i32_0 = arith.constant 0 : i32
    %c0_i32_1 = arith.constant 0 : i32
    return %c0_i32, %c0_i32_0 : i32, i32
  }
  func.func @transform_7(%arg0: i32) -> (i32, i32) {
    %c0_i32 = arith.constant 0 : i32
    %c0_i32_0 = arith.constant 0 : i32
    %c0_i32_1 = arith.constant 0 : i32
    return %c0_i32, %c0_i32_0 : i32, i32
  }
  func.func @transform_8(%arg0: i32) -> (i32, i32) {
    %c0_i32 = arith.constant 0 : i32
    %c0_i32_0 = arith.constant 0 : i32
    %c0_i32_1 = arith.constant 0 : i32
    return %c0_i32, %c0_i32_0 : i32, i32
  }
  func.func @transform_9(%arg0: i32) -> (i32, i32) {
    %c0_i32 = arith.constant 0 : i32
    %c0_i32_0 = arith.constant 0 : i32
    return %arg0, %c0_i32 : i32, i32
  }
}

</mosaic_0001>

<bundles_post_ra>
// kernel: tpu_custom_call.1
= control target key start
LH: loop header
LB: loop body
LE: loop exit
PB: predicated region body
PF: predicated region fallthrough
CT: control target
= control target key end

     0   :  { %14 = vsyncpa [#allocation3], 0  ;;  %s1079_s0 = inlined_call_operand.hbm [shape: f32[16,128], index: 0, kind: input, shape index: {}]   ;;  %s1080_s1 = inlined_call_operand.hbm [shape: bf16[128,128], index: 1, kind: input, shape index: {}]   ;;  %s1081_s2 = inlined_call_operand.vmem [shape: f32[1,128], index: 2, kind: input, shape index: {}]   ;;  %s1082_s3 = inlined_call_operand.hbm [shape: bf16[128,128], index: 3, kind: input, shape index: {}]   ;;  %s1083_s4 = inlined_call_operand.vmem [shape: f32[1,128], index: 4, kind: input, shape index: {}]   ;;  %s1084_s5 = inlined_call_operand.hbm [shape: bf16[128,128], index: 5, kind: input, shape index: {}]   ;;  %s1085_s6 = inlined_call_operand.vmem [shape: f32[1,128], index: 6, kind: input, shape index: {}]   ;;  %s1086_s7 = inlined_call_operand.hbm [shape: bf16[128,128], index: 7, kind: input, shape index: {}]   ;;  %s1087_s8 = inlined_call_operand.vmem [shape: f32[1,128], index: 8, kind: input, shape index: {}]   ;;  %s1088_s9 = inlined_call_operand.hbm [shape: f32[16,128], index: 9, kind: output, shape index: {}]  }
   0x1   :  { %15 = vsyncpa [#allocation6], 0 }
   0x2   :  { %16 = vsyncpa [#allocation9], 0 }
   0x3   :  { %17 = vsyncpa [#allocation4], 0  ;;  %s929_s30 = smov [#allocation5]  }
   0x4   :  { %s35_s10 = sshll.u32 %s929_s30, 4  ;;  %s36_s10 = int_to_ptr.vmem [resolvable:$true] %s35_s10 }
   0x5   :  { %s809_s11 = scalar_lea.vmem %s36_s10, 1024  ;;  %p814_p1 = scmp.lt.s32.totalorder %s36_s10, %s36_s10 }
   0x6   :  { %p810_p0 = scmp.ne.s32.totalorder %s36_s10, %s809_s11  ;;  %p815_p2 = scmp.lt.s32.totalorder %s809_s11, %s809_s11 }
   0x8   :  { %p816_p3 = por %p815_p2, %p814_p1 }
   0xa   :  { %p817_p4 = pnand %p816_p3, %p810_p0 }
   0xc   :  { %820 = shalt.err (!%p817_p4)
}
   0xd   :  { %s930_s12 = smov 64   ;;  %s931_s13 = smov 4  }
   0xe   :  { %41 = dma.hbm_to_vmem [thread:$0]  %s1080_s1, 1024, %s36_s10, [#allocation6], %s930_s12, %s930_s12, %s931_s13  }
   0xf   :  { %s932_s16 = smov [#allocation8]   ;;  %s933_s18 = smov [#allocation2]  }
  0x10   :  { %s63_s17 = sshll.u32 %s932_s16, 4  ;;  %s23_s19 = sshll.u32 %s933_s18, 4  ;;  %s64_s17 = int_to_ptr.vmem [resolvable:$true] %s63_s17  ;;  %s24_s19 = int_to_ptr.vmem [resolvable:$true] %s23_s19 }
  0x11   :  { %s829_s20 = scalar_lea.vmem %s64_s17, 1024  ;;  %p834_p6 = scmp.lt.s32.totalorder %s64_s17, %s64_s17 }
  0x12   :  { %p830_p5 = scmp.ne.s32.totalorder %s64_s17, %s829_s20  ;;  %p835_p7 = scmp.lt.s32.totalorder %s829_s20, %s829_s20 }
  0x14   :  { %p836_p8 = por %p835_p7, %p834_p6 }
  0x16   :  { %p837_p9 = pnand %p836_p8, %p830_p5 }
  0x18   :  { %840 = shalt.err (!%p837_p9)
}
  0x19   :  { %69 = dma.hbm_to_vmem [thread:$0]  %s1084_s5, 1024, %s64_s17, [#allocation9], %s930_s12, %s930_s12, %s931_s13  }
  0x1a   :  { %s849_s1 = scalar_lea.vmem %s24_s19, 256  ;;  %p854_p11 = scmp.lt.s32.totalorder %s24_s19, %s24_s19 }
  0x1b   :  { %p850_p10 = scmp.ne.s32.totalorder %s24_s19, %s849_s1  ;;  %p855_p12 = scmp.lt.s32.totalorder %s849_s1, %s849_s1 }
  0x1d   :  { %p856_p13 = por %p855_p12, %p854_p11 }
  0x1f   :  { %p857_p0 = pnand %p856_p13, %p850_p10 }
  0x21   :  { %860 = shalt.err (!%p857_p0)
}
  0x22   :  { %s934_s23 = smov 128   ;;  %s935_s24 = smov 8  }
  0x23   :  { %29 = dma.hbm_to_vmem [thread:$0]  %s1079_s0, 256, %s24_s19, [#allocation3], %s934_s23, %s934_s23, %s935_s24  }
  0x24   :  { %s936_s27 = smov [#allocation7]   ;;  %s937_s5 = smov [#allocation10]  }
  0x25   :  { %s49_s28 = sshll.u32 %s936_s27, 4  ;;  %s77_s29 = sshll.u32 %s937_s5, 4  ;;  %s50_s28 = int_to_ptr.vmem [resolvable:$true] %s49_s28  ;;  %s78_s29 = int_to_ptr.vmem [resolvable:$true] %s77_s29 }
  0x26   :  { %s869_s30 = scalar_lea.vmem %s50_s28, 1024  ;;  %p874_p2 = scmp.lt.s32.totalorder %s50_s28, %s50_s28 }
  0x27   :  { %p870_p1 = scmp.ne.s32.totalorder %s50_s28, %s869_s30  ;;  %p875_p3 = scmp.lt.s32.totalorder %s869_s30, %s869_s30 }
  0x29   :  { %p876_p4 = por %p875_p3, %p874_p2 }
  0x2b   :  { %p877_p5 = pnand %p876_p4, %p870_p1 }
  0x2d   :  { %880 = shalt.err (!%p877_p5)
}
  0x2e   :  { %55 = dma.hbm_to_vmem [thread:$0]  %s1082_s3, 1024, %s50_s28, [#allocation6], %s930_s12, %s930_s12, %s931_s13  }
  0x2f   :  { %s889_s0 = scalar_lea.vmem %s78_s29, 1024  ;;  %p894_p7 = scmp.lt.s32.totalorder %s78_s29, %s78_s29 }
  0x30   :  { %p890_p6 = scmp.ne.s32.totalorder %s78_s29, %s889_s0  ;;  %p895_p8 = scmp.lt.s32.totalorder %s889_s0, %s889_s0 }
  0x32   :  { %p896_p9 = por %p895_p8, %p894_p7 }
  0x34   :  { %p897_p10 = pnand %p896_p9, %p890_p6 }
  0x36   :  { %900 = shalt.err (!%p897_p10)
}
  0x37   :  { %83 = dma.hbm_to_vmem [thread:$0]  %s1086_s7, 1024, %s78_s29, [#allocation9], %s930_s12, %s930_s12, %s931_s13  }
  0x38   :  { %921 = dma.done.wait [#allocation3], 256  }
  0x39   :  { %922 = vsyncadd [#allocation3], 4294967040 }
  0x3a   :  { %923 = dma.done.wait [#allocation6], 2048  }
  0x3b   :  { %924 = vsyncadd [#allocation6], 4294965248 }
  0x3c   :  { %925 = dma.done.wait [#allocation9], 2048  }
  0x3d   :  { %926 = vsyncadd [#allocation9], 4294965248  ;;  %v938_v0 = vmov 0.0   ;;  %vm939_vm0 = vmmov 0   ;;  %v761_v1 = vld [vmem:[#allocation5 + $0x38] sm:$0xff]   ;;  %v762_v2 = vld [vmem:[#allocation5 + $0x30] sm:$0xff]  }
  0x3e   :  { %669 = vmatprep.subr.bf16.mxu0 %v938_v0  ;;  %685 = vmatprep.mubr.msk.bf16.mxu0 %vm939_vm0, %v938_v0  ;;  %v763_v3 = vld [vmem:[#allocation5 + $0x28] sm:$0xff]   ;;  %v769_v4 = vld [vmem:[#allocation7 + $0x38] sm:$0xff]   ;;  %v764_v5 = vld [vmem:[#allocation5 + $0x20] sm:$0xff]  }
  0x3f   :  { %689 = vmatprep.subr.bf16.mxu1 %v938_v0  ;;  %705 = vmatprep.mubr.msk.bf16.mxu1 %vm939_vm0, %v938_v0  ;;  %v770_v6 = vld [vmem:[#allocation7 + $0x30] sm:$0xff]   ;;  %v765_v7 = vld [vmem:[#allocation5 + $0x18] sm:$0xff]   ;;  %v771_v8 = vld [vmem:[#allocation7 + $0x28] sm:$0xff]  }
  0x40   :  { %670 = vmatpush3.bf16.msra.mxu0 %v761_v1  ;;  %690 = vmatpush3.bf16.msra.mxu1 %v769_v4  ;;  %v766_v9 = vld [vmem:[#allocation5 + $0x10] sm:$0xff]   ;;  %v772_v10 = vld [vmem:[#allocation7 + $0x20] sm:$0xff]   ;;  %v767_v11 = vld [vmem:[#allocation5 + $0x8] sm:$0xff]  }
  0x41   :  { %671 = vmatprep.subr.bf16.mxu0 %v938_v0  ;;  %691 = vmatprep.subr.bf16.mxu1 %v938_v0  ;;  %v773_v12 = vld [vmem:[#allocation7 + $0x18] sm:$0xff]   ;;  %v768_v13 = vld [vmem:[#allocation5] sm:$0xff]   ;;  %v106_v14 = vld [vmem:[#allocation2] sm:$0xff] }
  0x42   :  { %v107_v15 = vld [vmem:[#allocation2 + $0x8] sm:$0xff]  ;;  %v774_v17 = vld [vmem:[#allocation7 + $0x10] sm:$0xff]   ;;  %v775_v18 = vld [vmem:[#allocation7 + $0x8] sm:$0xff]  }
  0x43   :  { %v108_v16 = vpack.c.bf16 %v107_v15, %v106_v14  ;;  %v776_v19 = vld [vmem:[#allocation7] sm:$0xff]   ;;  %v777_v20 = vld [vmem:[#allocation8 + $0x38] sm:$0xff]   ;;  %v778_v21 = vld [vmem:[#allocation8 + $0x30] sm:$0xff]  }
  0x44   :  { %672 = vmatpush3.bf16.msra.mxu0 %v762_v2  ;;  %692 = vmatpush3.bf16.msra.mxu1 %v770_v6  ;;  %v779_v22 = vld [vmem:[#allocation8 + $0x28] sm:$0xff]   ;;  %v780_v23 = vld [vmem:[#allocation8 + $0x20] sm:$0xff]   ;;  %v781_v24 = vld [vmem:[#allocation8 + $0x18] sm:$0xff]  }
  0x45   :  { %673 = vmatprep.subr.bf16.mxu0 %v938_v0  ;;  %693 = vmatprep.subr.bf16.mxu1 %v938_v0  ;;  %v595_v25 = vld [vmem:[%s1081_s2] ss:$0 sm:$0xff]  ;;  %v783_v36 = vld [vmem:[#allocation8 + $0x8] sm:$0xff]   ;;  %v784_v37 = vld [vmem:[#allocation8] sm:$0xff]  }
  0x46   :  { %v782_v35 = vld [vmem:[#allocation8 + $0x10] sm:$0xff]   ;;  %v785_v38 = vld [vmem:[#allocation10 + $0x38] sm:$0xff]   ;;  %v787_v40 = vld [vmem:[#allocation10 + $0x28] sm:$0xff]  }
  0x47   :  { %v786_v39 = vld [vmem:[#allocation10 + $0x30] sm:$0xff]   ;;  %v788_v41 = vld [vmem:[#allocation10 + $0x20] sm:$0xff]   ;;  %v789_v42 = vld [vmem:[#allocation10 + $0x18] sm:$0xff]  }
  0x48   :  { %674 = vmatpush3.bf16.msra.mxu0 %v763_v3  ;;  %694 = vmatpush3.bf16.msra.mxu1 %v771_v8  ;;  %v604_v43 = vld [vmem:[%s1083_s4] ss:$0 sm:$0xff]  ;;  %v791_v54 = vld [vmem:[#allocation10 + $0x8] sm:$0xff]   ;;  %v792_v55 = vld [vmem:[#allocation10] sm:$0xff]  }
  0x49   :  { %675 = vmatprep.subr.bf16.mxu0 %v938_v0  ;;  %695 = vmatprep.subr.bf16.mxu1 %v938_v0  ;;  %v790_v53 = vld [vmem:[#allocation10 + $0x10] sm:$0xff]  }
  0x4a   :  { %v613_v56 = vld [vmem:[%s1085_s6] ss:$0 sm:$0xff]  ;;  %s940_s6 = smov [#allocation11]  }
  0x4b   :  { %s581_s18 = sshll.u32 %s940_s6, 4  ;;  %s582_s18 = int_to_ptr.vmem [resolvable:$true] %s581_s18 }
  0x4c   :  { %676 = vmatpush3.bf16.msra.mxu0 %v764_v5  ;;  %696 = vmatpush3.bf16.msra.mxu1 %v772_v10  ;;  %p906_p12 = scmp.lt.s32.totalorder %s582_s18, %s582_s18 }
  0x4d   :  { %677 = vmatprep.subr.bf16.mxu0 %v938_v0  ;;  %697 = vmatprep.subr.bf16.mxu1 %v938_v0 }
  0x50   :  { %678 = vmatpush3.bf16.msra.mxu0 %v765_v7  ;;  %698 = vmatpush3.bf16.msra.mxu1 %v773_v12 }
  0x51   :  { %679 = vmatprep.subr.bf16.mxu0 %v938_v0  ;;  %699 = vmatprep.subr.bf16.mxu1 %v938_v0 }
  0x54   :  { %680 = vmatpush3.bf16.msra.mxu0 %v766_v9  ;;  %700 = vmatpush3.bf16.msra.mxu1 %v774_v17 }
  0x55   :  { %681 = vmatprep.subr.bf16.mxu0 %v938_v0  ;;  %701 = vmatprep.subr.bf16.mxu1 %v938_v0 }
  0x58   :  { %682 = vmatpush3.bf16.msra.mxu0 %v767_v11  ;;  %702 = vmatpush3.bf16.msra.mxu1 %v775_v18 }
  0x59   :  { %683 = vmatprep.subr.bf16.mxu0 %v938_v0  ;;  %703 = vmatprep.subr.bf16.mxu1 %v938_v0 }
  0x5c   :  { %684 = vmatpush3.bf16.msra.mxu0 %v768_v13  ;;  %704 = vmatpush3.bf16.msra.mxu1 %v776_v19 }
  0x5d   :  { %709 = vmatprep.subr.bf16.mxu0 %v938_v0  ;;  %729 = vmatprep.subr.bf16.mxu1 %v938_v0 }
  0x5f   :  { %686 = vmatmul.mubr.bf16.vlgmr.msra.gmra.mxu0 %v108_v16 }
  0x60   :  { %725 = vmatprep.mubr.msk.bf16.mxu0 %vm939_vm0, %v938_v0  ;;  %710 = vmatpush3.bf16.msra.mxu0 %v777_v20 }
  0x61   :  { %711 = vmatprep.subr.bf16.mxu0 %v938_v0 }
  0x64   :  { %712 = vmatpush3.bf16.msra.mxu0 %v778_v21 }
  0x65   :  { %713 = vmatprep.subr.bf16.mxu0 %v938_v0 }
  0x68   :  { %714 = vmatpush3.bf16.msra.mxu0 %v779_v22 }
  0x69   :  { %715 = vmatprep.subr.bf16.mxu0 %v938_v0 }
  0x6c   :  { %716 = vmatpush3.bf16.msra.mxu0 %v780_v23 }
  0x6d   :  { %717 = vmatprep.subr.bf16.mxu0 %v938_v0 }
  0x70   :  { %718 = vmatpush3.bf16.msra.mxu0 %v781_v24 }
  0x71   :  { %719 = vmatprep.subr.bf16.mxu0 %v938_v0 }
  0x74   :  { %720 = vmatpush3.bf16.msra.mxu0 %v782_v35 }
  0x75   :  { %721 = vmatprep.subr.bf16.mxu0 %v938_v0 }
  0x78   :  { %722 = vmatpush3.bf16.msra.mxu0 %v783_v36 }
  0x79   :  { %723 = vmatprep.subr.bf16.mxu0 %v938_v0 }
  0x7c   :  { %724 = vmatpush3.bf16.msra.mxu0 %v784_v37 }
 0x11f   :  { %v213_v26 = vpop.f32.mrf.mxu0 }
 0x120   :  { %v214_v28 = vadd.f32 %v595_v25, %v213_v26 }
 0x121   :  { %v687_v27 = vpop.f32.mrf.mxu0 }
 0x122   :  { %v220_v32 = vmax.f32 %v214_v28, 0.0 }
 0x123   :  { %v216_v29 = vpop.f32.mrf.mxu0 }
 0x124   :  { %v217_v30 = vadd.f32 %v595_v25, %v216_v29 }
 0x125   :  { %v688_v31 = vpop.f32.mrf.mxu0 }
 0x126   :  { %v221_v33 = vmax.f32 %v217_v30, 0.0 }
 0x128   :  { %v222_v34 = vpack.c.bf16 %v221_v33, %v220_v32 }
 0x12a   :  { %706 = vmatmul.mubr.bf16.vlgmr.msra.gmra.mxu1 %v222_v34 }
 0x12b   :  { %745 = vmatprep.mubr.msk.bf16.mxu1 %vm939_vm0, %v938_v0  ;;  %730 = vmatpush3.bf16.msra.mxu1 %v785_v38 }
 0x12c   :  { %731 = vmatprep.subr.bf16.mxu1 %v938_v0 }
 0x12f   :  { %732 = vmatpush3.bf16.msra.mxu1 %v786_v39 }
 0x130   :  { %733 = vmatprep.subr.bf16.mxu1 %v938_v0 }
 0x133   :  { %734 = vmatpush3.bf16.msra.mxu1 %v787_v40 }
 0x134   :  { %735 = vmatprep.subr.bf16.mxu1 %v938_v0 }
 0x137   :  { %736 = vmatpush3.bf16.msra.mxu1 %v788_v41 }
 0x138   :  { %737 = vmatprep.subr.bf16.mxu1 %v938_v0 }
 0x13b   :  { %738 = vmatpush3.bf16.msra.mxu1 %v789_v42 }
 0x13c   :  { %739 = vmatprep.subr.bf16.mxu1 %v938_v0 }
 0x13f   :  { %740 = vmatpush3.bf16.msra.mxu1 %v790_v53 }
 0x140   :  { %741 = vmatprep.subr.bf16.mxu1 %v938_v0 }
 0x143   :  { %742 = vmatpush3.bf16.msra.mxu1 %v791_v54 }
 0x144   :  { %743 = vmatprep.subr.bf16.mxu1 %v938_v0  ;;  %v622_v0 = vld [vmem:[%s1087_s8] ss:$0 sm:$0xff]  ;;  %s901_s8 = scalar_lea.vmem %s582_s18, 256 }
 0x145   :  { %p902_p11 = scmp.ne.s32.totalorder %s582_s18, %s901_s8  ;;  %p907_p13 = scmp.lt.s32.totalorder %s901_s8, %s901_s8 }
 0x147   :  { %744 = vmatpush3.bf16.msra.mxu1 %v792_v55  ;;  %p908_p0 = por %p907_p13, %p906_p12 }
 0x149   :  { %p909_p1 = pnand %p908_p0, %p902_p11 }
 0x1ea   :  { %v327_v44 = vpop.f32.mrf.mxu1 }
 0x1eb   :  { %v328_v46 = vadd.f32 %v604_v43, %v327_v44 }
 0x1ec   :  { %v707_v45 = vpop.f32.mrf.mxu1 }
 0x1ed   :  { %v334_v50 = vmax.f32 %v328_v46, 0.0 }
 0x1ee   :  { %v330_v47 = vpop.f32.mrf.mxu1 }
 0x1ef   :  { %v331_v48 = vadd.f32 %v604_v43, %v330_v47 }
 0x1f0   :  { %v708_v49 = vpop.f32.mrf.mxu1 }
 0x1f1   :  { %v335_v51 = vmax.f32 %v331_v48, 0.0 }
 0x1f3   :  { %v336_v52 = vpack.c.bf16 %v335_v51, %v334_v50 }
 0x1f5   :  { %726 = vmatmul.mubr.bf16.vlgmr.msra.gmra.mxu0 %v336_v52 }
 0x2b5   :  { %v441_v57 = vpop.f32.mrf.mxu0 }
 0x2b6   :  { %v442_v59 = vadd.f32 %v613_v56, %v441_v57 }
 0x2b7   :  { %v727_v58 = vpop.f32.mrf.mxu0 }
 0x2b8   :  { %v448_v63 = vmax.f32 %v442_v59, 0.0 }
 0x2b9   :  { %v444_v60 = vpop.f32.mrf.mxu0 }
 0x2ba   :  { %v445_v61 = vadd.f32 %v613_v56, %v444_v60 }
 0x2bb   :  { %v728_v62 = vpop.f32.mrf.mxu0 }
 0x2bc   :  { %v449_v1 = vmax.f32 %v445_v61, 0.0 }
 0x2be   :  { %v450_v2 = vpack.c.bf16 %v449_v1, %v448_v63 }
 0x2c0   :  { %746 = vmatmul.mubr.bf16.vlgmr.msra.gmra.mxu1 %v450_v2 }
 0x380   :  { %v555_v3 = vpop.f32.mrf.mxu1 }
 0x381   :  { %v556_v4 = vadd.f32 %v622_v0, %v555_v3 }
 0x382   :  { %v747_v5 = vpop.f32.mrf.mxu1 }
 0x383   :  { %v631_v6 = vmul.f32 -1.442695, %v556_v4 }
 0x384   :  { %v558_v7 = vpop.f32.mrf.mxu1 }
 0x385   :  { %793 = vpow2.f32 %v631_v6  ;;  %v559_v8 = vadd.f32 %v622_v0, %v558_v7 }
 0x386   :  { %v748_v9 = vpop.f32.mrf.mxu1 }
 0x387   :  { %v632_v10 = vmul.f32 -1.442695, %v559_v8 }
 0x389   :  { %795 = vpow2.f32 %v632_v10 }
 0x392   :  { %v794_v11 = vpop.eup %793 }
 0x393   :  { %v568_v12 = vadd.f32 1.0, %v794_v11 }
 0x395   :  { %797 = vrcp.f32 %v568_v12 }
 0x396   :  { %v796_v13 = vpop.eup %795 }
 0x397   :  { %v569_v14 = vadd.f32 1.0, %v796_v13 }
 0x399   :  { %799 = vrcp.f32 %v569_v14 }
 0x3a2   :  { %v798_v15 = vpop.eup %797 }
 0x3a3   :  { %574 = vst [vmem:[#allocation11] sm:$0xff] %v798_v15 }
 0x3a6   :  { %v800_v16 = vpop.eup %799 }
 0x3a7   :  { %575 = vst [vmem:[#allocation11 + $0x8] sm:$0xff] %v800_v16 }
 0x3a8   :  { %912 = shalt.err (!%p909_p1)
}
 0x3a9   :  { %587 = dma.vmem_to_hbm [thread:$0]  %s582_s18, 256, %s1088_s9, [#allocation4], %s934_s23, %s934_s23, %s935_s24  }
 0x3aa   :  { %927 = dma.done.wait [#allocation4], 256  }
 0x3ab   :  { %928 = vsyncadd [#allocation4], 4294967040 }
 0x3ac   :  { %591 = vsyncpa [#allocation3], 1 }
 0x3ad   :  { %592 = vsyncpa [#allocation6], 1 }
 0x3ae   :  { %593 = vsyncpa [#allocation9], 1 }
 0x3af   :  { %594 = vsyncpa [#allocation4], 1 }

</bundles_post_ra>
